<compile_context>
chip_gen: v6e
topology: v6e:2x2x1
jax: 0.10.0
libtpu: 0.0.40
codegen_flags: <defaults>
</compile_context>

<pallas_src>
import numpy as np
import jax
import jax.numpy as jnp
from jax import lax
from jax.experimental import pallas as pl
from jax.experimental.pallas import tpu as pltpu


_TWO_PI = 2.0 * np.pi
_INV_TWO_PI = 1.0 / _TWO_PI
_INV_PI = 1.0 / np.pi


def _make_sawtooth_kernel(fs: float, is_reversed: bool, B: int, tile_t: int):
    scale = _TWO_PI / float(fs)
    n_scan_steps = int(np.ceil(np.log2(tile_t))) if tile_t > 1 else 0

    def kernel(phase0_ref, f0_ref, sig_ref, final_ref, carry_ref):
        t = pl.program_id(0)

        # Seed the running phase prefix with the initial phase on the first tile.
        @pl.when(t == 0)
        def _():
            carry_ref[...] = phase0_ref[...]

        f0 = f0_ref[...]                                   # (B, tile_t) f32
        incr = f0 * jnp.float32(scale)                     # 2*pi*f0/fs

        # Hillis–Steele inclusive scan along the lane (time) axis:
        # log2(tile_t) roll + masked-add steps; no MXU, no T x T matrix.
        lane = lax.broadcasted_iota(jnp.int32, (B, tile_t), 1)
        x = incr
        shift = 1
        for _ in range(n_scan_steps):
            rolled = pltpu.roll(x, shift, axis=1)          # x[(i - shift) mod n]
            x = x + jnp.where(lane >= shift, rolled, jnp.float32(0.0))
            shift *= 2

        phase = x + carry_ref[...]                         # (B,1) carry broadcast

        # phase mod 2*pi via reciprocal multiply (no divides).
        mod = phase - jnp.float32(_TWO_PI) * jnp.floor(
            phase * jnp.float32(_INV_TWO_PI))

        if is_reversed:
            # (2*pi - mod)/pi - 1 == 1 - mod/pi
            signal = jnp.float32(1.0) - mod * jnp.float32(_INV_PI)
        else:
            signal = mod * jnp.float32(_INV_PI) - jnp.float32(1.0)

        sig_ref[...] = jnp.where(f0 > 0, signal, jnp.float32(0.0))

        # Carry the running prefix to the next tile, wrapped mod 2*pi so the
        # f32 accumulator does not lose precision for long T.
        new_carry = phase[:, tile_t - 1:tile_t]
        carry_ref[...] = new_carry - jnp.float32(_TWO_PI) * jnp.floor(
            new_carry * jnp.float32(_INV_TWO_PI))

        # Post-mod phase at the last column; the (B, 1) output block is resident
        # across the whole grid, so writing it once on the final tile suffices.
        @pl.when(t == pl.num_programs(0) - 1)
        def _():
            last_mod = mod[:, tile_t - 1:tile_t]
            if is_reversed:
                final_ref[...] = jnp.float32(_TWO_PI) - last_mod
            else:
                final_ref[...] = last_mod

    return kernel


def _choose_tile_t(T: int) -> int:
    # Largest tile <= T (min 128); big tiles amortize per-grid-step overhead.
    for cand in (4096, 2048, 1024, 512, 256, 128):
        if T >= cand:
            return cand
    return 128


def sawtooth_generator(f0, initial_phase=None, *, fs=16000.0, is_reversed=True):
    """f0: (B, T, 1), initial_phase: (B, 1, 1) or None.
    Returns (signal (B, T), final_phase (B, 1, 1))."""
    f0 = f0.astype(jnp.float32)
    B, T, _ = f0.shape
    if initial_phase is None:
        initial_phase = jnp.zeros((B, 1, 1), dtype=jnp.float32)
    initial_phase = initial_phase.astype(jnp.float32)

    tile_t = _choose_tile_t(T)
    n_tiles = pl.cdiv(T, tile_t)
    t_pad = n_tiles * tile_t

    f0_2d = f0.reshape(B, T)
    if t_pad != T:
        # Zero-pad the tail: zero f0 adds nothing to the cumulative phase and is
        # masked out of the signal, so carry and final phase are unaffected.
        f0_2d = jnp.pad(f0_2d, ((0, 0), (0, t_pad - T)))
    phase0_2d = initial_phase.reshape(B, 1)

    kernel = _make_sawtooth_kernel(fs, is_reversed, B, tile_t)

    signal_pad, final_2d = pl.pallas_call(
        kernel,
        out_shape=(
            jax.ShapeDtypeStruct((B, t_pad), jnp.float32),
            jax.ShapeDtypeStruct((B, 1), jnp.float32),
        ),
        grid=(n_tiles,),
        in_specs=[
            pl.BlockSpec((B, 1), lambda t: (0, 0)),        # initial phase (resident)
            pl.BlockSpec((B, tile_t), lambda t: (0, t)),   # f0 tiles (pipelined)
        ],
        out_specs=(
            pl.BlockSpec((B, tile_t), lambda t: (0, t)),   # signal tiles
            pl.BlockSpec((B, 1), lambda t: (0, 0)),        # final phase (resident)
        ),
        scratch_shapes=[pltpu.VMEM((B, 1), jnp.float32)],  # running phase carry
        compiler_params=pltpu.CompilerParams(
            dimension_semantics=("arbitrary",)),
    )(phase0_2d, f0_2d)

    signal = signal_pad[:, :T]
    return signal, final_2d.reshape(B, 1, 1)


def _reference(f0, initial_phase, fs, is_reversed):
    """Pure-JAX reference matching the PyTorch forward."""
    B = f0.shape[0]
    if initial_phase is None:
        initial_phase = jnp.zeros((B, 1, 1), dtype=f0.dtype)
    mask = (f0 > 0).astype(f0.dtype)
    phase = jnp.cumsum(2 * np.pi * f0 / fs, axis=1) + initial_phase
    if is_reversed:
        phase = 2 * np.pi - phase % (2 * np.pi)
    else:
        phase = phase % (2 * np.pi)
    signal = phase / np.pi - 1
    signal = signal * mask
    signal = jnp.squeeze(signal, -1)
    final_phase = phase[:, -1:, :]
    return signal, final_phase


if __name__ == "__main__":
    key = jax.random.PRNGKey(0)
    B, T = 2, 300           # non-multiple of the tile -> exercises padding + multi-tile carry
    fs = 16000.0

    k1, k2 = jax.random.split(key)
    # f0 in a plausible audio range with some non-positive entries so the mask matters.
    f0 = jax.random.uniform(k1, (B, T, 1), jnp.float32, minval=-50.0, maxval=440.0)
    initial_phase = jax.random.uniform(k2, (B, 1, 1), jnp.float32,
                                       minval=0.0, maxval=2 * np.pi)

    for is_reversed in (True, False):
        signal, final_phase = sawtooth_generator(
            f0, initial_phase, fs=fs, is_reversed=is_reversed)
        signal = jax.block_until_ready(signal)
        final_phase = jax.block_until_ready(final_phase)

        ref_sig, ref_final = _reference(f0, initial_phase, fs, is_reversed)
        assert signal.shape == (B, T) and final_phase.shape == (B, 1, 1)
        np.testing.assert_allclose(np.asarray(signal), np.asarray(ref_sig),
                                   rtol=1e-5, atol=1e-4)
        np.testing.assert_allclose(np.asarray(final_phase), np.asarray(ref_final),
                                   rtol=1e-5, atol=1e-4)

    print("KERNEL_OK")
</pallas_src>

<mosaic_0001>
module attributes {stable_mosaic.version = 11 : i64} {
  func.func @kernel(%arg0: i32, %arg1: memref<2x1xf32, #tpu.memory_space<vmem>>, %arg2: memref<2x256xf32, #tpu.memory_space<vmem>>, %arg3: memref<2x256xf32, #tpu.memory_space<vmem>>, %arg4: memref<2x1xf32, #tpu.memory_space<vmem>>, %arg5: memref<2x1xf32, #tpu.memory_space<vmem>>) attributes {dimension_semantics = [#tpu.dimension_semantics<arbitrary>], iteration_bounds = array<i64: 2>, scalar_prefetch = 0 : i64, scratch_operands = 1 : i64, tpu.core_type = #tpu.core_type<tc>, window_params = [{pipeline_mode = #tpu.pipeline_mode<synchronous>, transform_indices = @transform_0, window_bounds = array<i64: 2, 1>}, {transform_indices = @transform_1, window_bounds = array<i64: 2, 256>}, {transform_indices = @transform_2, window_bounds = array<i64: 2, 256>}, {pipeline_mode = #tpu.pipeline_mode<synchronous>, transform_indices = @transform_3, window_bounds = array<i64: 2, 1>}]} {
    %c0_i32 = arith.constant 0 : i32
    %0 = arith.cmpi eq, %arg0, %c0_i32 : i32
    %1 = arith.extui %0 : i1 to i32
    %c0_i32_0 = arith.constant 0 : i32
    %2 = arith.cmpi ne, %1, %c0_i32_0 : i32
    scf.if %2 {
      %c0_34 = arith.constant 0 : index
      %c0_35 = arith.constant 0 : index
      %84 = vector.load %arg1[%c0_34, %c0_35] : memref<2x1xf32, #tpu.memory_space<vmem>>, vector<2x1xf32>
      %c0_36 = arith.constant 0 : index
      %c0_37 = arith.constant 0 : index
      %85 = vector.load %arg5[%c0_36, %c0_37] : memref<2x1xf32, #tpu.memory_space<vmem>>, vector<2x1xf32>
      tpu.vector_store %arg5[%c0_36, %c0_37], %84 {strides = array<i32>} : memref<2x1xf32, #tpu.memory_space<vmem>>, vector<2x1xf32>,
    } else {
    }
    %c0 = arith.constant 0 : index
    %c0_1 = arith.constant 0 : index
    %3 = vector.load %arg2[%c0, %c0_1] : memref<2x256xf32, #tpu.memory_space<vmem>>, vector<2x256xf32>
    %cst = arith.constant 3.9269909E-4 : f32
    %4 = vector.broadcast %cst : f32 to vector<2x256xf32>
    %5 = arith.mulf %3, %4 : vector<2x256xf32>
    %6 = tpu.iota {dimensions = array<i32: 1>} : vector<2x256xi32>
    %c1_i32 = arith.constant 1 : i32
    %7 = tpu.dynamic_rotate %5 by %c1_i32 dim 1 : vector<2x256xf32>, i32 -> vector<2x256xf32>
    %c1_i32_2 = arith.constant 1 : i32
    %8 = vector.broadcast %c1_i32_2 : i32 to vector<2x256xi32>
    %9 = arith.cmpi sge, %6, %8 : vector<2x256xi32>
    %cst_3 = arith.constant 0.000000e+00 : f32
    %10 = vector.broadcast %cst_3 : f32 to vector<2x256xf32>
    %11 = arith.select %9, %7, %10 : vector<2x256xi1>, vector<2x256xf32>
    %12 = arith.addf %5, %11 : vector<2x256xf32>
    %c2_i32 = arith.constant 2 : i32
    %13 = tpu.dynamic_rotate %12 by %c2_i32 dim 1 : vector<2x256xf32>, i32 -> vector<2x256xf32>
    %c2_i32_4 = arith.constant 2 : i32
    %14 = vector.broadcast %c2_i32_4 : i32 to vector<2x256xi32>
    %15 = arith.cmpi sge, %6, %14 : vector<2x256xi32>
    %cst_5 = arith.constant 0.000000e+00 : f32
    %16 = vector.broadcast %cst_5 : f32 to vector<2x256xf32>
    %17 = arith.select %15, %13, %16 : vector<2x256xi1>, vector<2x256xf32>
    %18 = arith.addf %12, %17 : vector<2x256xf32>
    %c4_i32 = arith.constant 4 : i32
    %19 = tpu.dynamic_rotate %18 by %c4_i32 dim 1 : vector<2x256xf32>, i32 -> vector<2x256xf32>
    %c4_i32_6 = arith.constant 4 : i32
    %20 = vector.broadcast %c4_i32_6 : i32 to vector<2x256xi32>
    %21 = arith.cmpi sge, %6, %20 : vector<2x256xi32>
    %cst_7 = arith.constant 0.000000e+00 : f32
    %22 = vector.broadcast %cst_7 : f32 to vector<2x256xf32>
    %23 = arith.select %21, %19, %22 : vector<2x256xi1>, vector<2x256xf32>
    %24 = arith.addf %18, %23 : vector<2x256xf32>
    %c8_i32 = arith.constant 8 : i32
    %25 = tpu.dynamic_rotate %24 by %c8_i32 dim 1 : vector<2x256xf32>, i32 -> vector<2x256xf32>
    %c8_i32_8 = arith.constant 8 : i32
    %26 = vector.broadcast %c8_i32_8 : i32 to vector<2x256xi32>
    %27 = arith.cmpi sge, %6, %26 : vector<2x256xi32>
    %cst_9 = arith.constant 0.000000e+00 : f32
    %28 = vector.broadcast %cst_9 : f32 to vector<2x256xf32>
    %29 = arith.select %27, %25, %28 : vector<2x256xi1>, vector<2x256xf32>
    %30 = arith.addf %24, %29 : vector<2x256xf32>
    %c16_i32 = arith.constant 16 : i32
    %31 = tpu.dynamic_rotate %30 by %c16_i32 dim 1 : vector<2x256xf32>, i32 -> vector<2x256xf32>
    %c16_i32_10 = arith.constant 16 : i32
    %32 = vector.broadcast %c16_i32_10 : i32 to vector<2x256xi32>
    %33 = arith.cmpi sge, %6, %32 : vector<2x256xi32>
    %cst_11 = arith.constant 0.000000e+00 : f32
    %34 = vector.broadcast %cst_11 : f32 to vector<2x256xf32>
    %35 = arith.select %33, %31, %34 : vector<2x256xi1>, vector<2x256xf32>
    %36 = arith.addf %30, %35 : vector<2x256xf32>
    %c32_i32 = arith.constant 32 : i32
    %37 = tpu.dynamic_rotate %36 by %c32_i32 dim 1 : vector<2x256xf32>, i32 -> vector<2x256xf32>
    %c32_i32_12 = arith.constant 32 : i32
    %38 = vector.broadcast %c32_i32_12 : i32 to vector<2x256xi32>
    %39 = arith.cmpi sge, %6, %38 : vector<2x256xi32>
    %cst_13 = arith.constant 0.000000e+00 : f32
    %40 = vector.broadcast %cst_13 : f32 to vector<2x256xf32>
    %41 = arith.select %39, %37, %40 : vector<2x256xi1>, vector<2x256xf32>
    %42 = arith.addf %36, %41 : vector<2x256xf32>
    %c64_i32 = arith.constant 64 : i32
    %43 = tpu.dynamic_rotate %42 by %c64_i32 dim 1 : vector<2x256xf32>, i32 -> vector<2x256xf32>
    %c64_i32_14 = arith.constant 64 : i32
    %44 = vector.broadcast %c64_i32_14 : i32 to vector<2x256xi32>
    %45 = arith.cmpi sge, %6, %44 : vector<2x256xi32>
    %cst_15 = arith.constant 0.000000e+00 : f32
    %46 = vector.broadcast %cst_15 : f32 to vector<2x256xf32>
    %47 = arith.select %45, %43, %46 : vector<2x256xi1>, vector<2x256xf32>
    %48 = arith.addf %42, %47 : vector<2x256xf32>
    %c128_i32 = arith.constant 128 : i32
    %49 = tpu.dynamic_rotate %48 by %c128_i32 dim 1 : vector<2x256xf32>, i32 -> vector<2x256xf32>
    %c128_i32_16 = arith.constant 128 : i32
    %50 = vector.broadcast %c128_i32_16 : i32 to vector<2x256xi32>
    %51 = arith.cmpi sge, %6, %50 : vector<2x256xi32>
    %cst_17 = arith.constant 0.000000e+00 : f32
    %52 = vector.broadcast %cst_17 : f32 to vector<2x256xf32>
    %53 = arith.select %51, %49, %52 : vector<2x256xi1>, vector<2x256xf32>
    %54 = arith.addf %48, %53 : vector<2x256xf32>
    %c0_18 = arith.constant 0 : index
    %c0_19 = arith.constant 0 : index
    %55 = vector.load %arg5[%c0_18, %c0_19] : memref<2x1xf32, #tpu.memory_space<vmem>>, vector<2x1xf32>
    %56 = vector.broadcast %55 : vector<2x1xf32> to vector<2x256xf32>
    %57 = arith.addf %54, %56 : vector<2x256xf32>
    %cst_20 = arith.constant 0.159154937 : f32
    %58 = vector.broadcast %cst_20 : f32 to vector<2x256xf32>
    %59 = arith.mulf %57, %58 : vector<2x256xf32>
    %60 = math.floor %59 : vector<2x256xf32>
    %cst_21 = arith.constant 6.28318548 : f32
    %61 = vector.broadcast %cst_21 : f32 to vector<2x256xf32>
    %62 = arith.mulf %61, %60 : vector<2x256xf32>
    %63 = arith.subf %57, %62 : vector<2x256xf32>
    %cst_22 = arith.constant 0.318309873 : f32
    %64 = vector.broadcast %cst_22 : f32 to vector<2x256xf32>
    %65 = arith.mulf %63, %64 : vector<2x256xf32>
    %cst_23 = arith.constant 1.000000e+00 : f32
    %66 = vector.broadcast %cst_23 : f32 to vector<2x256xf32>
    %67 = arith.subf %66, %65 : vector<2x256xf32>
    %cst_24 = arith.constant 0.000000e+00 : f32
    %68 = vector.broadcast %cst_24 : f32 to vector<2x256xf32>
    %69 = arith.cmpf ogt, %3, %68 : vector<2x256xf32>
    %cst_25 = arith.constant 0.000000e+00 : f32
    %70 = vector.broadcast %cst_25 : f32 to vector<2x256xf32>
    %71 = arith.select %69, %67, %70 : vector<2x256xi1>, vector<2x256xf32>
    %c0_26 = arith.constant 0 : index
    %c0_27 = arith.constant 0 : index
    %72 = vector.load %arg3[%c0_26, %c0_27] : memref<2x256xf32, #tpu.memory_space<vmem>>, vector<2x256xf32>
    tpu.vector_store %arg3[%c0_26, %c0_27], %71 {strides = array<i32>} : memref<2x256xf32, #tpu.memory_space<vmem>>, vector<2x256xf32>,
    %73 = vector.extract_strided_slice %57 {offsets = [0, 255], sizes = [2, 1], strides = [1, 1]} : vector<2x256xf32> to vector<2x1xf32>
    %cst_28 = arith.constant 0.159154937 : f32
    %74 = vector.broadcast %cst_28 : f32 to vector<2x1xf32>
    %75 = arith.mulf %73, %74 : vector<2x1xf32>
    %76 = math.floor %75 : vector<2x1xf32>
    %cst_29 = arith.constant 6.28318548 : f32
    %77 = vector.broadcast %cst_29 : f32 to vector<2x1xf32>
    %78 = arith.mulf %77, %76 : vector<2x1xf32>
    %79 = arith.subf %73, %78 : vector<2x1xf32>
    %c0_30 = arith.constant 0 : index
    %c0_31 = arith.constant 0 : index
    %80 = vector.load %arg5[%c0_30, %c0_31] : memref<2x1xf32, #tpu.memory_space<vmem>>, vector<2x1xf32>
    tpu.vector_store %arg5[%c0_30, %c0_31], %79 {strides = array<i32>} : memref<2x1xf32, #tpu.memory_space<vmem>>, vector<2x1xf32>,
    %c1_i32_32 = arith.constant 1 : i32
    %81 = arith.cmpi eq, %arg0, %c1_i32_32 : i32
    %82 = arith.extui %81 : i1 to i32
    %c0_i32_33 = arith.constant 0 : i32
    %83 = arith.cmpi ne, %82, %c0_i32_33 : i32
    scf.if %83 {
      %84 = vector.extract_strided_slice %63 {offsets = [0, 255], sizes = [2, 1], strides = [1, 1]} : vector<2x256xf32> to vector<2x1xf32>
      %cst_34 = arith.constant 6.28318548 : f32
      %85 = vector.broadcast %cst_34 : f32 to vector<2x1xf32>
      %86 = arith.subf %85, %84 : vector<2x1xf32>
      %c0_35 = arith.constant 0 : index
      %c0_36 = arith.constant 0 : index
      %87 = vector.load %arg4[%c0_35, %c0_36] : memref<2x1xf32, #tpu.memory_space<vmem>>, vector<2x1xf32>
      tpu.vector_store %arg4[%c0_35, %c0_36], %86 {strides = array<i32>} : memref<2x1xf32, #tpu.memory_space<vmem>>, vector<2x1xf32>,
    } else {
    }
    return
  }
  func.func @transform_0(%arg0: i32) -> (i32, i32) {
    %c0_i32 = arith.constant 0 : i32
    %c0_i32_0 = arith.constant 0 : i32
    %c0_i32_1 = arith.constant 0 : i32
    return %c0_i32, %c0_i32_0 : i32, i32
  }
  func.func @transform_1(%arg0: i32) -> (i32, i32) {
    %c0_i32 = arith.constant 0 : i32
    %c0_i32_0 = arith.constant 0 : i32
    return %c0_i32, %arg0 : i32, i32
  }
  func.func @transform_2(%arg0: i32) -> (i32, i32) {
    %c0_i32 = arith.constant 0 : i32
    %c0_i32_0 = arith.constant 0 : i32
    return %c0_i32, %arg0 : i32, i32
  }
  func.func @transform_3(%arg0: i32) -> (i32, i32) {
    %c0_i32 = arith.constant 0 : i32
    %c0_i32_0 = arith.constant 0 : i32
    %c0_i32_1 = arith.constant 0 : i32
    return %c0_i32, %c0_i32_0 : i32, i32
  }
}

</mosaic_0001>

<bundles_post_ra>
// kernel: tpu_custom_call.1
= control target key start
LH: loop header
LB: loop body
LE: loop exit
PB: predicated region body
PF: predicated region fallthrough
CT: control target
= control target key end

     0   :  { %9 = vsyncpa [#allocation4], 0  ;;  %s1003_s0 = inlined_call_operand.vmem [shape: f32[2,1], index: 0, kind: input, shape index: {}]   ;;  %s1004_s1 = inlined_call_operand.hbm [shape: f32[2,512], index: 1, kind: input, shape index: {}]   ;;  %s1005_s2 = inlined_call_operand.hbm [shape: f32[2,512], index: 2, kind: output, shape index: {0}]   ;;  %s1006_s3 = inlined_call_operand.vmem [shape: f32[2,1], index: 3, kind: output, shape index: {1}]  }
   0x1   :  { %11 = vsyncpa [#allocation4 + $0x1], 0 }
   0x2   :  { %12 = vsyncpa [#allocation5], 0 }
   0x3   :  { %14 = vsyncpa [#allocation5 + $0x1], 0  ;;  %s805_s12 = smov 0   ;;  %s807_s13 = smov 0  }
   0x4   :  { %s809_s14 = smov 0   ;;  %s811_s15 = smov 0  }
   0x5 LB: > { %s826_s16 = sadd.s32 4294967295, %s769_s15   ;;  %s600_s17 = sadd.s32 4294967294, %s769_s15   ;;  %s769_s15 = sphi %s811_s15, %s1023_s15   ;;  %s765_s14 = sphi %s809_s14, %s1022_s14   ;;  %s761_s13 = sphi %s807_s13, %s1021_s13   ;;  %s757_s12 = sphi %s805_s12, %s1020_s12  }
   0x6   : > { %s830_s18 = sadd.s32 1, %s769_s15   ;;  %s48_s19 = sadd.s32 1, %s765_s14 }
   0x7   : > { %s45_s20 = ssub.s32 %s769_s15, %s830_s18  ;;  %p55_p0 = scmp.ne.s32.totalorder %s765_s14, %s761_s13 }
   0x8   : > { %p46_p1 = scmp.eq.s32.totalorder %s45_s20, 0  ;;  %p56_p2 = scmp.eq.s32.totalorder %s769_s15, 0 }
   0x9   : > { %p61_p3 = scmp.ne.s32.totalorder %s761_s13, %s757_s12  ;;  %p62_p4 = scmp.eq.s32.totalorder %s826_s16, 0 }
   0xa   : > { %s842_s21 = scalar_select %p46_p1, %s765_s14, %s48_s19  }
   0xb   : > { %p844_p5 = por %p56_p2, %p55_p0  ;;  %p848_p6 = por %p62_p4, %p61_p3 }
   0xc   : > { %p85_p7 = scmp.eq.s32.totalorder %s826_s16, 1  ;;  %p91_p8 = scmp.eq.s32.totalorder %s600_s17, 1 }
   0xd   : > { %s1010_s23 = scalar_select %p848_p6, 1, 0 }
   0xe   : > { %p630_p10 = scmp.lt.s32.totalorder %s769_s15, 2  ;;  %p855_p11 = por %p85_p7, %p55_p0 }
   0xf   : > { %p859_p12 = por %p91_p8, %p61_p3  ;;  %s135_s26 = sand.u32 1, %s765_s14  }
  0x10   : > { %s1011_s24 = scalar_select %p855_p11, 1, 0 }
  0x11   : > { %s1012_s25 = scalar_select %p859_p12, 1, 0 }
  0x12   : > { %s616_s27 = sshll.u32 %s769_s15, 6  ;;  %s603_s28 = sshll.u32 %s135_s26, 2 }
  0x13   : > { %s868_s4 = scalar_lea.hbm %s1004_s1, %s616_s27  ;;  %s139_s5 = scalar_lea.vmem [#allocation3], %s603_s28 }
  0x14   : > { %s147_s6 = sshll.u32 %s139_s5, 4  ;;  %p872_p13 = pnand %p630_p10, %p844_p5  ;;  %s876_s6 = int_to_ptr.vmem [resolvable:$true] %s147_s6 }
  0x15   : > { %s136_s8 = scalar_lea.sflag [#allocation4], %s135_s26  ;;  %s677_s9 = scalar_lea.hbm %s868_s4, 64 }
  0x16   : > { %p678_p2 = scmp.ne.s32.totalorder %s868_s4, %s677_s9  ;;  %p679_p3 = pneg %p872_p13 }
  0x17   : > { %s682_s17 = scalar_lea.hbm %s1004_s1, 128  ;;  %p683_p5 = scmp.lt.s32.totalorder %s868_s4, %s1004_s1 }
  0x18   : > { %p680_p4 = pnand %p679_p3, %p678_p2  ;;  %p684_p8 = scmp.lt.s32.totalorder %s682_s17, %s677_s9 }
  0x1a   : > { %p681_p7 = pneg %p680_p4  ;;  %p685_p10 = por %p684_p8, %p683_p5 }
  0x1c   : > { %p686_p9 = pnand %p685_p10, %p681_p7 }
  0x1e   : > { %689 = shalt.err (!%p686_p9)
}
  0x1f   : > { %s690_s22 = scalar_lea.vmem %s876_s6, 64  ;;  %s771_s26 = smov [#allocation3]  }
  0x20   : > { %p691_p0 = scmp.ne.s32.totalorder %s876_s6, %s690_s22  ;;  %s695_s27 = sshll.u32 %s771_s26, 4  ;;  %s696_s27 = int_to_ptr.vmem [resolvable:$false] %s695_s27 }
  0x21   : > { %s697_s28 = scalar_lea.vmem %s696_s27, 128  ;;  %p698_p4 = scmp.lt.s32.totalorder %s876_s6, %s696_s27 }
  0x22   : > { %p693_p1 = pnand %p691_p0, %p679_p3  ;;  %p699_p12 = scmp.lt.s32.totalorder %s697_s28, %s690_s22 }
  0x24   : > { %p694_p2 = pneg %p693_p1  ;;  %p700_p11 = por %p699_p12, %p698_p4 }
  0x26   : > { %p701_p6 = pnand %p700_p11, %p694_p2 }
  0x28   : > { %704 = shalt.err (!%p701_p6)
}
  0x29   : > { %625 = dma.hbm_to_vmem [thread:$0]  (!%p872_p13), %s868_s4, 64, %s876_s6, %s136_s8  }
  0x2a   : > { %p1014_p9 = scmp.lt.s32.totalorder %s769_s15, 3  ;;  %p1015_p7 = scmp.ge.s32.totalorder %s769_s15, 1 }
  0x2c   : > { %p153_p0 = pnand %p1015_p7, %p1014_p9 }
  0x2d   : > { %s903_s29 = sand.u32 (!%p153_p0), 1, %s761_s13   ;;  %p1016_p6 = scmp.ne.s32.totalorder (!%p153_p0), %s1010_s23, 0 }
  0x2e   : > { %156 = sbr.rel (%p153_p0) target bundleno = 1241 (0x4d9), region = 28  ;;  %s607_s30 = sshll.u32 (!%p153_p0), %s903_s29, 2 }
  0x2f   : > { %s159_s5 = scalar_lea.sflag (!%p153_p0), [#allocation4], %s903_s29  ;;  %s162_s9 = scalar_lea.vmem (!%p153_p0), [#allocation3], %s607_s30 }
  0x33   : > { %748 = dma.done.wait (%p1016_p6), %s159_s5, 64  }
  0x34   : > { %750 = vsyncadd (%p1016_p6), %s159_s5, 4294967232  ;;  %s911_s7 = scalar_lea.vmem [#allocation6], %s607_s30  ;;  %p609_p11 = scmp.ne.s32.totalorder %s826_s16, 0 }
  0x36   : > { %190 = sbr.rel (%p609_p11) target bundleno = 61 (0x3d), region = 36 }
  0x3b   : > { %v191_v0 = vld [vmem:[%s1003_s0] sm:$0x3]  ;;  %vm192_vm0 = vcmask 1024  }
  0x3c   : > { %193 = vst.msk [vmem:[#allocation2] sm:$0x3] %vm192_vm0, %v191_v0 }
  0x3d PF: > { %v917_v1 = vld [vmem:[%s162_s9] sm:$0xf]  ;;  %v196_v2 = vlaneseq  ;;  %v772_v3 = vmov 1983009808   ;;  %s773_s23 = smov 1   ;;  %s774_s8 = smov 2  }
  0x3e   : > { %v201_v4 = vunpack.c.l.s4 %v772_v3  ;;  %v195_v6 = vmul.f32 0.0003926991, %v917_v1  ;;  %s775_s10 = smov 4   ;;  %s776_s11 = smov 8   ;;  %v779_v62 = vmov 0   ;;  %vm484_vm15 = vcmp.gt.f32.partialorder %v917_v1, 0.0 }
  0x3f   : > { %v919_v5 = vshrl.u32 %v196_v2, 7  ;;  %v928_v11 = vand.u32 127, %v196_v2  ;;  %s777_s17 = smov 16   ;;  %s778_s19 = smov 32   ;;  %676 = vset.pattern.permute.xlu0 %v779_v62  ;;  %vm496_vm0 = vcmask 1024  }
  0x40   : > { %v202_v7 = vunpack.c.0.s8 %v201_v4  ;;  %s780_s20 = smov 64   ;;  %p610_p12 = scmp.ne.s32.totalorder %s826_s16, 1 }
  0x41   : > { %vm214_vm1 = vcmp.lt.s32.totalorder %v928_v11, 1  ;;  %vm217_vm2 = vcmp.ge.s32.totalorder %v928_v11, 1  ;;  %vm248_vm3 = vcmp.lt.s32.totalorder %v928_v11, 2  ;;  %vm251_vm4 = vcmp.ge.s32.totalorder %v928_v11, 2  ;;  %s783_s22 = smov (!%p610_p12), 1  }
  0x42   : > { %v923_v8 = vsub.s32 %v202_v7, %v919_v5  ;;  %vm282_vm5 = vcmp.lt.s32.totalorder %v928_v11, 4  ;;  %vm285_vm6 = vcmp.ge.s32.totalorder %v928_v11, 4  ;;  %vm316_vm7 = vcmp.lt.s32.totalorder %v928_v11, 8 }
  0x43   : > { %vm319_vm8 = vcmp.ge.s32.totalorder %v928_v11, 8  ;;  %vm350_vm9 = vcmp.lt.s32.totalorder %v928_v11, 16  ;;  %vm353_vm10 = vcmp.ge.s32.totalorder %v928_v11, 16  ;;  %vm384_vm11 = vcmp.lt.s32.totalorder %v928_v11, 32 }
  0x44   : > { %v206_v9 = vrot.slane %v195_v6, %v923_v8  ;;  %vm387_vm12 = vcmp.ge.s32.totalorder %v928_v11, 32  ;;  %vm418_vm13 = vcmp.lt.s32.totalorder %v928_v11, 64  ;;  %vm421_vm14 = vcmp.ge.s32.totalorder %v928_v11, 64 }
  0x46   : > { %210 = vrot.lane.b32.xlu0 %v206_v9, %s773_s23  ;;  %v207_v10 = vcombine.high %v206_v9, %v206_v9 }
  0x4a   : > { %212 = vrot.lane.b32.xlu0 %v207_v10, %s773_s23 }
  0xb8   : > { %v211_v12 = vpop.permute.xlu0 %210 }
  0xbc   : > { %v213_v13 = vpop.permute.xlu0 %212 }
  0xbd   : > { %v215_v14 = vsel %vm214_vm1, %v211_v12, %v213_v13  ;;  %v216_v15 = vsel %vm214_vm1, %v213_v13, %v211_v12  ;;  %v464_v13 = vld [vmem:[#allocation2] sm:$0x3] }
  0xbe   : > { %v219_v16 = vsel %vm217_vm2, %v216_v15, 0.0 }
  0xbf   : > { %v223_v17 = vcombine.low %v219_v16, %v215_v14 }
  0xc1   : > { %v230_v18 = vrot.slane %v223_v17, %v923_v8 }
  0xc3   : > { %v232_v19 = vadd.f32 %v230_v18, %v195_v6  ;;  %v781_v18 = vmov 269488144  }
  0xc5   : > { %v240_v20 = vrot.slane %v232_v19, %v923_v8 }
  0xc7   : > { %244 = vrot.lane.b32.xlu1 %v240_v20, %s774_s8  ;;  %v241_v21 = vcombine.high %v240_v20, %v240_v20 }
  0xcb   : > { %246 = vrot.lane.b32.xlu1 %v241_v21, %s774_s8 }
 0x139   : > { %v245_v22 = vpop.permute.xlu1 %244 }
 0x13d   : > { %v247_v23 = vpop.permute.xlu1 %246 }
 0x13e   : > { %v249_v24 = vsel %vm248_vm3, %v245_v22, %v247_v23  ;;  %v250_v25 = vsel %vm248_vm3, %v247_v23, %v245_v22 }
 0x13f   : > { %v253_v26 = vsel %vm251_vm4, %v250_v25, 0.0 }
 0x140   : > { %v257_v27 = vcombine.low %v253_v26, %v249_v24 }
 0x142   : > { %v264_v28 = vrot.slane %v257_v27, %v923_v8 }
 0x144   : > { %v266_v29 = vadd.f32 %v264_v28, %v232_v19  ;;  %v470_v19 = vunpack.c.l.s4 %v781_v18  ;;  %v782_v28 = vmov 0.0  }
 0x146   : > { %v274_v30 = vrot.slane %v266_v29, %v923_v8  ;;  %v471_v23 = vunpack.c.0.s8 %v470_v19 }
 0x148   : > { %278 = vrot.lane.b32.xlu0 %v274_v30, %s775_s10  ;;  %v275_v31 = vcombine.high %v274_v30, %v274_v30  ;;  %v474_v25 = vsub.s32 %v471_v23, %v919_v5 }
 0x14a   : > { %280 = vrot.lane.b32.xlu1 %v275_v31, %s775_s10 }
 0x1ba   : > { %v279_v32 = vpop.permute.xlu0 %278 }
 0x1bc   : > { %v281_v33 = vpop.permute.xlu1 %280 }
 0x1bd   : > { %v283_v34 = vsel %vm282_vm5, %v279_v32, %v281_v33  ;;  %v284_v35 = vsel %vm282_vm5, %v281_v33, %v279_v32 }
 0x1be   : > { %v287_v36 = vsel %vm285_vm6, %v284_v35, 0.0 }
 0x1bf   : > { %v291_v37 = vcombine.low %v287_v36, %v283_v34 }
 0x1c1   : > { %v298_v38 = vrot.slane %v291_v37, %v923_v8 }
 0x1c3   : > { %v300_v39 = vadd.f32 %v298_v38, %v266_v29 }
 0x1c5   : > { %v308_v40 = vrot.slane %v300_v39, %v923_v8 }
 0x1c7   : > { %312 = vrot.lane.b32.xlu0 %v308_v40, %s776_s11  ;;  %v309_v41 = vcombine.high %v308_v40, %v308_v40 }
 0x1c9   : > { %314 = vrot.lane.b32.xlu1 %v309_v41, %s776_s11 }
 0x239   : > { %v313_v42 = vpop.permute.xlu0 %312 }
 0x23b   : > { %v315_v43 = vpop.permute.xlu1 %314 }
 0x23c   : > { %v317_v44 = vsel %vm316_vm7, %v313_v42, %v315_v43  ;;  %v318_v45 = vsel %vm316_vm7, %v315_v43, %v313_v42 }
 0x23d   : > { %v321_v46 = vsel %vm319_vm8, %v318_v45, 0.0 }
 0x23e   : > { %v325_v47 = vcombine.low %v321_v46, %v317_v44 }
 0x240   : > { %v332_v48 = vrot.slane %v325_v47, %v923_v8 }
 0x242   : > { %v334_v49 = vadd.f32 %v332_v48, %v300_v39 }
 0x244   : > { %v342_v50 = vrot.slane %v334_v49, %v923_v8 }
 0x246   : > { %346 = vrot.lane.b32.xlu0 %v342_v50, %s777_s17  ;;  %v343_v51 = vcombine.high %v342_v50, %v342_v50 }
 0x248   : > { %348 = vrot.lane.b32.xlu1 %v343_v51, %s777_s17 }
 0x2b8   : > { %v347_v52 = vpop.permute.xlu0 %346 }
 0x2ba   : > { %v349_v53 = vpop.permute.xlu1 %348 }
 0x2bb   : > { %v351_v54 = vsel %vm350_vm9, %v347_v52, %v349_v53  ;;  %v352_v55 = vsel %vm350_vm9, %v349_v53, %v347_v52 }
 0x2bc   : > { %v355_v56 = vsel %vm353_vm10, %v352_v55, 0.0 }
 0x2bd   : > { %v359_v57 = vcombine.low %v355_v56, %v351_v54 }
 0x2bf   : > { %v366_v58 = vrot.slane %v359_v57, %v923_v8 }
 0x2c1   : > { %v368_v59 = vadd.f32 %v366_v58, %v334_v49 }
 0x2c3   : > { %v376_v60 = vrot.slane %v368_v59, %v923_v8 }
 0x2c5   : > { %380 = vrot.lane.b32.xlu0 %v376_v60, %s778_s19  ;;  %v377_v61 = vcombine.high %v376_v60, %v376_v60 }
 0x2c7   : > { %382 = vrot.lane.b32.xlu1 %v377_v61, %s778_s19 }
 0x337   : > { %v381_v63 = vpop.permute.xlu0 %380 }
 0x339   : > { %v383_v0 = vpop.permute.xlu1 %382 }
 0x33a   : > { %v385_v2 = vsel %vm384_vm11, %v381_v63, %v383_v0  ;;  %v386_v3 = vsel %vm384_vm11, %v383_v0, %v381_v63 }
 0x33b   : > { %v389_v4 = vsel %vm387_vm12, %v386_v3, 0.0 }
 0x33c   : > { %v393_v6 = vcombine.low %v389_v4, %v385_v2 }
 0x33e   : > { %v400_v7 = vrot.slane %v393_v6, %v923_v8 }
 0x340   : > { %v402_v9 = vadd.f32 %v400_v7, %v368_v59 }
 0x342   : > { %v410_v10 = vrot.slane %v402_v9, %v923_v8 }
 0x344   : > { %414 = vrot.lane.b32.xlu0 %v410_v10, %s780_s20  ;;  %v411_v12 = vcombine.high %v410_v10, %v410_v10 }
 0x346   : > { %416 = vrot.lane.b32.xlu1 %v411_v12, %s780_s20 }
 0x348   : > { %467 = vperm.xlu0 %676, %v464_v13  }
 0x3b6   : > { %v415_v14 = vpop.permute.xlu0 %414 }
 0x3b8   : > { %v417_v15 = vpop.permute.xlu1 %416 }
 0x3b9   : > { %v419_v16 = vsel %vm418_vm13, %v415_v14, %v417_v15  ;;  %v420_v17 = vsel %vm418_vm13, %v417_v15, %v415_v14 }
 0x3ba   : > { %v423_v20 = vsel %vm421_vm14, %v420_v17, 0.0 }
 0x3bb   : > { %v427_v21 = vcombine.low %v423_v20, %v419_v16 }
 0x3bd   : > { %v434_v22 = vrot.slane %v427_v21, %v923_v8 }
 0x3bf   : > { %v436_v24 = vadd.f32 %v434_v22, %v402_v9 }
 0x3c1   : > { %v444_v26 = vrot.slane %v436_v24, %v923_v8 }
 0x3c3   : > { %v468_v27 = vpop.permute.xlu0 %467  ;;  %v454_v11 = vcombine.low %v782_v28, %v444_v26 }
 0x3c4   : > { %v475_v30 = vrot.slane %v468_v27, %v474_v25 }
 0x3c5   : > { %v461_v29 = vrot.slane %v454_v11, %v923_v8 }
 0x3c7   : > { %v463_v31 = vadd.f32 %v461_v29, %v436_v24 }
 0x3c9   : > { %v477_v32 = vadd.f32 %v475_v30, %v463_v31 }
 0x3cb   : > { %v478_v33 = vmul.f32 0.15915494, %v477_v32  ;;  %488 = vrot.lane.b32.xlu1 %v477_v32, %s773_s23 }
 0x3cd   : > { %v479_v34 = vfloor.f32 %v478_v33 }
 0x3cf   : > { %v480_v35 = vmul.f32 6.2831855, %v479_v34 }
 0x3d1   : > { %v481_v36 = vsub.f32 %v477_v32, %v480_v35 }
 0x3d3   : > { %v482_v37 = vmul.f32 0.31830987, %v481_v36 }
 0x3d5   : > { %v483_v5 = vsub.f32 1.0, %v482_v37 }
 0x3d7   : > { %v485_v38 = vsel %vm484_vm15, %v483_v5, 0.0 }
 0x3d8   : > { %486 = vst [vmem:[%s911_s7] sm:$0xf] %v485_v38 }
 0x43d   : > { %v489_v39 = vpop.permute.xlu1 %488 }
 0x43e   : > { %v490_v40 = vrot.slane %v489_v39, 2 }
 0x440   : > { %v492_v41 = vmul.f32 0.15915494, %v490_v40 }
 0x442   : > { %v493_v42 = vfloor.f32 %v492_v41 }
 0x444   : > { %v494_v8 = vmul.f32 6.2831855, %v493_v42  ;;  %501 = sbr.rel (%p610_p12) target bundleno = 1217 (0x4c1), region = 40 }
 0x446   : > { %v495_v43 = vsub.f32 %v490_v40, %v494_v8 }
 0x448   : > { %497 = vst.msk [vmem:[#allocation2] sm:$0x3] %vm496_vm0, %v495_v43 }
 0x449   : > { %503 = vrot.lane.b32.xlu0 %v481_v36, %s783_s22 }
 0x4bb   : > { %v504_v44 = vpop.permute.xlu0 %503 }
 0x4bc   : > { %v505_v45 = vrot.slane %v504_v44, 2 }
 0x4be   : > { %v507_v46 = vsub.f32 6.2831855, %v505_v45 }
 0x4c0   : > { %508 = vst.msk [vmem:[%s1006_s3] sm:$0x3] %vm496_vm0, %v507_v46 }
 0x4c1 PF: > { %s617_s28 = sshll.u32 %s826_s16, 6  ;;  %s524_s4 = sshll.u32 %s911_s7, 4  ;;  %s525_s4 = int_to_ptr.vmem [resolvable:$true] %s524_s4 }
 0x4c2   : > { %s522_s9 = scalar_lea.hbm %s1005_s2, %s617_s28  ;;  %s510_s6 = scalar_lea.sflag [#allocation5], %s903_s29 }
 0x4c3   : > { %s705_s23 = scalar_lea.vmem %s525_s4, 64  ;;  %p1017_p1 = scmp.ne.s32.totalorder %s1011_s24, 0 }
 0x4c4   : > { %p706_p13 = scmp.ne.s32.totalorder %s525_s4, %s705_s23  ;;  %s784_s8 = smov [#allocation6]  }
 0x4c5   : > { %s709_s10 = sshll.u32 %s784_s8, 4  ;;  %s710_s10 = int_to_ptr.vmem [resolvable:$false] %s709_s10 }
 0x4c6   : > { %p707_p3 = pnand %p706_p13, %p1017_p1  ;;  %s711_s11 = scalar_lea.vmem %s710_s10, 128 }
 0x4c7   : > { %p712_p8 = scmp.lt.s32.totalorder %s525_s4, %s710_s10  ;;  %p713_p10 = scmp.lt.s32.totalorder %s711_s11, %s705_s23 }
 0x4c8   : > { %p708_p5 = pneg %p707_p3 }
 0x4c9   : > { %p714_p2 = por %p713_p10, %p712_p8 }
 0x4cb   : > { %p715_p4 = pnand %p714_p2, %p708_p5 }
 0x4cd   : > { %718 = shalt.err (!%p715_p4)
}
 0x4ce   : > { %s719_s16 = scalar_lea.hbm %s522_s9, 64  ;;  %s723_s17 = scalar_lea.hbm %s1005_s2, 128 }
 0x4cf   : > { %p720_p9 = scmp.ne.s32.totalorder %s522_s9, %s719_s16  ;;  %p724_p6 = scmp.lt.s32.totalorder %s522_s9, %s1005_s2 }
 0x4d0   : > { %p725_p11 = scmp.lt.s32.totalorder %s723_s17, %s719_s16 }
 0x4d1   : > { %p721_p7 = pnand %p720_p9, %p1017_p1 }
 0x4d2   : > { %p726_p12 = por %p725_p11, %p724_p6 }
 0x4d3   : > { %p722_p0 = pneg %p721_p7 }
 0x4d5   : > { %p727_p13 = pnand %p726_p12, %p722_p0 }
 0x4d7   : > { %730 = shalt.err (!%p727_p13)
}
 0x4d8   : > { %620 = dma.vmem_to_hbm [thread:$0]  (%p1017_p1), %s525_s4, 64, %s522_s9, %s510_s6  }
 0x4d9 PF: > { %s542_s22 = sand.u32 1, %s757_s12   ;;  %p1018_p3 = scmp.ne.s32.totalorder %s1012_s25, 0 }
 0x4da   : > { %p1019_p5 = scmp.ge.s32.totalorder %s769_s15, 2  ;;  %s543_s26 = scalar_lea.sflag [#allocation5], %s542_s22 }
 0x4dc   : > { %p627_p8 = pnand %p1019_p5, %p1018_p3 }
 0x4de   : > { %p628_p10 = pneg %p627_p8 }
 0x4e0   : > { %752 = dma.done.wait (%p628_p10), %s543_s26, 64  }
 0x4e1   : > { %754 = vsyncadd (%p628_p10), %s543_s26, 4294967232  ;;  %p17_p2 = scmp.ge.s32.totalorder %s830_s18, 4   ;;  %s1020_s12 = smov %s761_s13 }
 0x4e2   : > { %s1021_s13 = smov %s765_s14  ;;  %s1022_s14 = smov %s842_s21 }
 0x4e3   : > { %s1023_s15 = smov %s830_s18  ;;  %19 = sbr.rel (!%p17_p2) target bundleno = 5 (0x5), region = 89 }
 0x4e8   :  { %548 = vsyncpa [#allocation4], 1 }
 0x4e9   :  { %550 = vsyncpa [#allocation4 + $0x1], 1 }
 0x4ea   :  { %551 = vsyncpa [#allocation5], 1 }
 0x4eb   :  { %553 = vsyncpa [#allocation5 + $0x1], 1 }

</bundles_post_ra>
